<compile_context>
chip_gen: v7x
topology: tpu7x:2x2x1
jax: 0.10.0
libtpu: 0.0.40
codegen_flags: <defaults>
</compile_context>

<pallas_src>
import math
import functools

import jax
import jax.numpy as jnp
from jax.experimental import pallas as pl
from jax.experimental.pallas import tpu as pltpu


# ---------------------------------------------------------------------------
# Constant sinusoidal PE table (a registered buffer in the PyTorch module).
# ---------------------------------------------------------------------------
def make_pe_table(embedding_dim: int, max_len: int = 5000,
                  dtype=jnp.float32) -> jnp.ndarray:
    """Sinusoidal positional-encoding table, shape [max_len, embedding_dim]."""
    position = jnp.arange(max_len, dtype=jnp.float32)[:, None]            # [L, 1]
    div_term = jnp.exp(
        jnp.arange(0, embedding_dim, 2, dtype=jnp.float32)
        * (-math.log(10000.0) / embedding_dim)
    )                                                                     # [E/2]
    pe = jnp.zeros((max_len, embedding_dim), dtype=jnp.float32)
    pe = pe.at[:, 0::2].set(jnp.sin(position * div_term))
    pe = pe.at[:, 1::2].set(jnp.cos(position * div_term))
    return pe.astype(dtype)


# ---------------------------------------------------------------------------
# Kernels.  Batch dim is squeezed: every ref is a 2-D [TS, E] tile.
# ---------------------------------------------------------------------------
def _pe_add_kernel(x_ref, pe_ref, o_ref):
    """Eval mode: out = x + pe."""
    o_ref[...] = x_ref[...] + pe_ref[...]


def _pe_add_dropout_kernel(x_ref, pe_ref, bits_ref, o_ref, *,
                           keep_threshold: int, inv_keep: float):
    """Train mode: out = dropout(x + pe, p) with 1/(1-p) rescale.

    bits_ref holds uniform uint32 random bits; keep iff bits >= threshold,
    where threshold = round(p * 2^32) (computed at trace time).  This is a
    single integer compare per element — no shift / uint->float convert / mul.
    """
    y = x_ref[...] + pe_ref[...]
    keep = bits_ref[...] >= jnp.uint32(keep_threshold)
    o_ref[...] = jnp.where(keep, y * inv_keep, 0.0).astype(o_ref.dtype)


# ---------------------------------------------------------------------------
# Wrapper.
# ---------------------------------------------------------------------------
def _choose_seq_tile(S: int, E: int, itemsize: int,
                     target_bytes: int = 2 * 1024 * 1024,
                     max_rows: int = 1024) -> int:
    """Largest S tile that is <= ~2 MiB, <= 1024 rows, a multiple of 8 (or S)."""
    ts = target_bytes // max(1, E * itemsize)
    ts = min(ts, max_rows, S)
    ts = max(8, (ts // 8) * 8)
    if ts >= S:
        return S
    return ts


def positional_encoding_forward(x, pe_table, *, p: float = 0.1,
                                training: bool = True, rng_key=None):
    """x: [B, S, E].  Returns dropout(x + pe[:S], p) (p disabled in eval)."""
    B, S, E = x.shape
    assert pe_table.shape[0] >= S and pe_table.shape[1] == E
    dtype = x.dtype
    itemsize = jnp.dtype(dtype).itemsize
    pe_slice = pe_table[:S, :].astype(dtype)                 # [S, E]

    p_eff = float(p) if training else 0.0

    ts = _choose_seq_tile(S, E, itemsize)
    num_s_tiles = pl.cdiv(S, ts)
    # S-tile is the OUTER axis, batch the INNER axis: the PE tile's block
    # index is unchanged across the inner batch loop (stays resident on a
    # single TensorCore).  All iterations are independent -> both parallel.
    grid = (num_s_tiles, B)

    squeezed = pl.Squeezed() if hasattr(pl, "Squeezed") else None
    x_spec   = pl.BlockSpec((squeezed, ts, E), lambda s, b: (b, s, 0))
    pe_spec  = pl.BlockSpec((ts, E),           lambda s, b: (s, 0))
    out_spec = pl.BlockSpec((squeezed, ts, E), lambda s, b: (b, s, 0))

    # VMEM budget: double-buffered x / out / (bits) tiles + PE tile.
    n_tiled_bytes = ts * E * (3 * itemsize + (4 if p_eff > 0.0 else 0))
    vmem_limit = int(min(max(2 * 2 * n_tiled_bytes, 32 * 1024 * 1024),
                         48 * 1024 * 1024))
    compiler_params = pltpu.CompilerParams(
        dimension_semantics=("parallel", "parallel"),
        vmem_limit_bytes=vmem_limit,
    )

    bytes_accessed = 2 * B * S * E * itemsize + S * E * itemsize
    if p_eff > 0.0:
        bytes_accessed += B * S * E * 4                      # uint32 bits stream
    cost = pl.CostEstimate(flops=B * S * E * (3 if p_eff > 0.0 else 1),
                           transcendentals=0,
                           bytes_accessed=bytes_accessed)

    if p_eff > 0.0:
        if rng_key is None:
            rng_key = jax.random.PRNGKey(0)
        # TODO(synk): on real TPU the bits could be drawn in-kernel with
        # pltpu.prng_seed / prng_random_bits (saves one HBM stream), but that
        # primitive has no CPU/interpret lowering, so bits are generated here.
        bits = jax.random.bits(rng_key, (B, S, E), dtype=jnp.uint32)
        keep_threshold = min(int(round(p_eff * (1 << 32))), (1 << 32) - 1)
        kernel = functools.partial(_pe_add_dropout_kernel,
                                   keep_threshold=keep_threshold,
                                   inv_keep=1.0 / (1.0 - p_eff))
        bits_spec = pl.BlockSpec((squeezed, ts, E), lambda s, b: (b, s, 0))
        return pl.pallas_call(
            kernel,
            out_shape=jax.ShapeDtypeStruct((B, S, E), dtype),
            grid=grid,
            in_specs=[x_spec, pe_spec, bits_spec],
            out_specs=out_spec,
            compiler_params=compiler_params,
            cost_estimate=cost,
        )(x, pe_slice, bits)

    return pl.pallas_call(
        _pe_add_kernel,
        out_shape=jax.ShapeDtypeStruct((B, S, E), dtype),
        grid=grid,
        in_specs=[x_spec, pe_spec],
        out_specs=out_spec,
        compiler_params=compiler_params,
        cost_estimate=cost,
    )(x, pe_slice)


if __name__ == "__main__":
    # Small demo shapes: E = 128 (lane-dense, multiple of 128) and S large
    # enough to exercise the S-axis tiling (2 S-tiles of 1024 rows).
    B, S, E = 2, 2048, 128
    max_len = 5000
    dropout_p = 0.1

    key = jax.random.PRNGKey(0)
    kx, kd = jax.random.split(key)
    x = jax.random.normal(kx, (B, S, E), dtype=jnp.float32)
    pe_table = make_pe_table(E, max_len=max_len)
    ref_eval = x + pe_table[None, :S, :]

    # 1) Eval-mode (dropout disabled) -- exact semantics vs. reference.
    out_eval = jax.block_until_ready(
        positional_encoding_forward(x, pe_table, p=dropout_p, training=False))
    assert out_eval.shape == (B, S, E)
    assert jnp.allclose(out_eval, ref_eval, atol=1e-6), "eval-mode mismatch"

    # 2) Training-mode (dropout active, deterministic key).
    out_train = jax.block_until_ready(
        positional_encoding_forward(x, pe_table, p=dropout_p,
                                    training=True, rng_key=kd))
    assert out_train.shape == (B, S, E)
    scaled_ref = ref_eval / (1.0 - dropout_p)
    surviving = out_train != 0.0
    # Every surviving element equals (x+pe)/(1-p); dropped elements are 0.
    assert jnp.allclose(jnp.where(surviving, out_train, scaled_ref),
                        scaled_ref, atol=1e-5, rtol=1e-5), "dropout scaling mismatch"
    drop_frac = float(1.0 - jnp.mean(surviving.astype(jnp.float32)))
    assert abs(drop_frac - dropout_p) < 0.02, f"drop fraction {drop_frac} far from p"

    print("KERNEL_OK")
</pallas_src>

<mosaic_0001>
module attributes {stable_mosaic.version = 11 : i64} {
  func.func @_pe_add_kernel(%arg0: i32, %arg1: i32, %arg2: memref<1x1024x128xf32, #tpu.memory_space<vmem>>, %arg3: memref<1024x128xf32, #tpu.memory_space<vmem>>, %arg4: memref<1x1024x128xf32, #tpu.memory_space<vmem>>) attributes {dimension_semantics = [#tpu.dimension_semantics<parallel>, #tpu.dimension_semantics<parallel>], iteration_bounds = array<i64: 2, 2>, scalar_prefetch = 0 : i64, scratch_operands = 0 : i64, tpu.core_type = #tpu.core_type<tc>, window_params = [{transform_indices = @transform_0, window_bounds = array<i64: 1, 1024, 128>}, {transform_indices = @transform_1, window_bounds = array<i64: 1024, 128>}, {transform_indices = @transform_2, window_bounds = array<i64: 1, 1024, 128>}]} {
    %c0 = arith.constant 0 : index
    %c0_0 = arith.constant 0 : index
    %c0_1 = arith.constant 0 : index
    %0 = vector.load %arg2[%c0, %c0_0, %c0_1] : memref<1x1024x128xf32, #tpu.memory_space<vmem>>, vector<1x1024x128xf32>
    %1 = vector.shape_cast %0 : vector<1x1024x128xf32> to vector<1024x128xf32>
    %c0_2 = arith.constant 0 : index
    %c0_3 = arith.constant 0 : index
    %2 = vector.load %arg3[%c0_2, %c0_3] : memref<1024x128xf32, #tpu.memory_space<vmem>>, vector<1024x128xf32>
    %3 = arith.addf %1, %2 : vector<1024x128xf32>
    %c0_4 = arith.constant 0 : index
    %c0_5 = arith.constant 0 : index
    %c0_6 = arith.constant 0 : index
    %4 = vector.load %arg4[%c0_4, %c0_5, %c0_6] : memref<1x1024x128xf32, #tpu.memory_space<vmem>>, vector<1x1024x128xf32>
    %5 = vector.shape_cast %4 : vector<1x1024x128xf32> to vector<1024x128xf32>
    %6 = vector.shape_cast %3 : vector<1024x128xf32> to vector<1x1024x128xf32>
    tpu.vector_store %arg4[%c0_4, %c0_5, %c0_6], %6 {strides = array<i32>} : memref<1x1024x128xf32, #tpu.memory_space<vmem>>, vector<1x1024x128xf32>,
    return
  }
  func.func @transform_0(%arg0: i32, %arg1: i32) -> (i32, i32, i32) {
    %c0_i32 = arith.constant 0 : i32
    %c0_i32_0 = arith.constant 0 : i32
    return %arg1, %arg0, %c0_i32 : i32, i32, i32
  }
  func.func @transform_1(%arg0: i32, %arg1: i32) -> (i32, i32) {
    %c0_i32 = arith.constant 0 : i32
    %c0_i32_0 = arith.constant 0 : i32
    return %arg0, %c0_i32 : i32, i32
  }
  func.func @transform_2(%arg0: i32, %arg1: i32) -> (i32, i32, i32) {
    %c0_i32 = arith.constant 0 : i32
    %c0_i32_0 = arith.constant 0 : i32
    return %arg1, %arg0, %c0_i32 : i32, i32, i32
  }
}

</mosaic_0001>

<bundles_post_ra>
// kernel: tpu_custom_call.1
= control target key start
LH: loop header
LB: loop body
LE: loop exit
PB: predicated region body
PF: predicated region fallthrough
CT: control target
= control target key end

     0   :  { %s1914_s0 = inlined_call_operand.hbm [shape: f32[2,2048,128], index: 0, kind: input, shape index: {}]   ;;  %s1915_s1 = inlined_call_operand.hbm [shape: f32[2048,128], index: 1, kind: input, shape index: {}]   ;;  %s1916_s2 = inlined_call_operand.hbm [shape: f32[2,2048,128], index: 2, kind: output, shape index: {}]  }
   0x1   :  { %1928 = sst [smem:[#allocation14_spill]] %s1916_s2 }
   0x2   :  { %7 = vsyncpa [#allocation3], 0 }
   0x3   :  { %9 = vsyncpa [#allocation3 + $0x1], 0 }
   0x4   :  { %10 = vsyncpa [#allocation6], 0 }
   0x5   :  { %12 = vsyncpa [#allocation6 + $0x1], 0 }
   0x6   :  { %13 = vsyncpa [#allocation4], 0 }
   0x7   :  { %15 = vsyncpa [#allocation4 + $0x1], 0  ;;  %s1207_s9 = smov 0   ;;  %s1209_s10 = smov 0  }
   0x8   :  { %s1211_s11 = smov 0   ;;  %s1213_s12 = smov 0  }
   0x9   :  { %s1215_s13 = smov 0   ;;  %s1217_s14 = smov 0  }
   0xa   :  { %s1219_s15 = smov 0   ;;  %s1221_s16 = smov 0  }
   0xb   :  { %s1223_s17 = smov 0   ;;  %s1225_s18 = smov 0  }
   0xc   :  { %s1227_s19 = smov 0  }
   0xd LB: > { %1929 = sst [smem:[#allocation11_spill]] %s1155_s12  ;;  %s864_s20 = sadd.s32 4294967295, %s1183_s19   ;;  %s1183_s19 = sphi %s1227_s19, %s21_s19   ;;  %s1179_s18 = sphi %s1225_s18, %s1965_s18   ;;  %s1175_s17 = sphi %s1223_s17, %s1964_s17   ;;  %s1171_s16 = sphi %s1221_s16, %s1963_s16   ;;  %s1167_s15 = sphi %s1219_s15, %s1962_s15   ;;  %s1163_s14 = sphi %s1217_s14, %s1961_s14   ;;  %s1159_s13 = sphi %s1215_s13, %s1960_s13   ;;  %s1155_s12 = sphi %s1213_s12, %s1959_s12   ;;  %s1151_s11 = sphi %s1211_s11, %s1958_s11   ;;  %s1147_s10 = sphi %s1209_s10, %s1957_s10   ;;  %s1143_s9 = sphi %s1207_s9, %s1956_s9  }
   0xe   : > { %s865_s21 = sadd.s32 4294967294, %s1183_s19   ;;  %s30_s22 = sadd.s32 1, %s1175_s17 }
   0xf   : > { %s33_s23 = sadd.s32 1, %s1179_s18  ;;  %p31_p0 = scmp.ge.s32.totalorder %s30_s22, 2 }
  0x10   : > { %s42_s24 = sadd.s32 1, %s1163_s14  ;;  %p49_p1 = scmp.ne.s32.totalorder %s1163_s14, %s1159_s13 }
  0x11   : > { %p1922_p2 = scmp.eq.s32.totalorder %s1183_s19, 0  ;;  %s1967_s22 = smov (%p31_p0, %s30_s22), 0 }
  0x12   : > { %1930 = sst [smem:[#allocation12_spill]] %s1967_s22  ;;  %s1969_s23 = smov (!%p31_p0, %s33_s23), %s1179_s18 }
  0x13   : > { %s37_s25 = ssub.s32 %s1175_s17, %s1967_s22  ;;  %p1277_p3 = por %p1922_p2, %p49_p1 }
  0x14   : > { %p35_p4 = scmp.ge.s32.totalorder %s1969_s23, 2  ;;  %p55_p5 = scmp.ne.s32.totalorder %s1159_s13, %s1155_s12 }
  0x15   : > { %p1283_p6 = scmp.eq.s32.totalorder %s864_s20, 0  ;;  %p107_p7 = scmp.eq.s32.totalorder %s864_s20, 3 }
  0x16   : > { %s1971_s23 = smov (%p35_p4, %s1969_s23), 0  ;;  %p113_p10 = scmp.eq.s32.totalorder %s865_s21, 3 }
  0x17   : > { %1933 = sst [smem:[#allocation13_spill]] %s1971_s23  ;;  %p1291_p8 = por %p1283_p6, %p55_p5 }
  0x18   : > { %p1295_p9 = por %p107_p7, %p49_p1  ;;  %s1301_s30 = ssub.s32 %s1179_s18, %s1971_s23 }
  0x19   : > { %s1934_s28 = scalar_select %p1291_p8, 1, 0 }
  0x1a   : > { %s1935_s29 = scalar_select %p1295_p9, 1, 0 }
  0x1b   : > { %s39_s3 = sor.u32 %s1301_s30, %s37_s25  ;;  %p1305_p13 = por %p113_p10, %p55_p5 }
  0x1c   : > { %p40_p12 = scmp.eq.s32.totalorder %s39_s3, 0  ;;  %p1921_p0 = scmp.lt.s32.totalorder %s1183_s19, 4 }
  0x1d   : > { %s1936_s4 = scalar_select %p1305_p13, 1, 0 }
  0x1e   : > { %s1311_s5 = scalar_select %p40_p12, %s1163_s14, %s42_s24  }
  0x1f   : > { %s133_s6 = sand.u32 1, %s1163_s14   ;;  %s869_s7 = sshll.u32 %s1179_s18, 7 }
  0x20   : > { %s868_s8 = sshll.u32 %s133_s6, 10  ;;  %s870_s20 = sshll.u32 %s1175_s17, 8 }
  0x21   : > { %s143_s23 = sadd.s32 %s870_s20, %s869_s7  ;;  %s137_s22 = scalar_lea.vmem [#allocation2], %s868_s8 }
  0x22   : > { %s146_s21 = sshll.u32 %s137_s22, 4  ;;  %s871_s25 = sshll.u32 %s143_s23, 7  ;;  %s1316_s21 = int_to_ptr.vmem [resolvable:$true] %s146_s21 }
  0x23   : > { %s1321_s3 = scalar_lea.hbm %s1914_s0, %s871_s25  ;;  %p1327_p1 = pnand %p1921_p0, %p1277_p3 }
  0x24   : > { %s1332_s22 = scalar_lea.sflag [#allocation3], %s133_s6  ;;  %s997_s23 = scalar_lea.hbm %s1321_s3, 16384 }
  0x25   : > { %p998_p5 = scmp.ne.s32.totalorder %s1321_s3, %s997_s23  ;;  %p999_p7 = pneg %p1327_p1 }
  0x26   : > { %s1002_s26 = scalar_lea.hbm %s1914_s0, 65536  ;;  %p1003_p3 = scmp.lt.u32.totalorder %s1321_s3, %s1914_s0 }
  0x27   : > { %p1000_p10 = pnand %p999_p7, %p998_p5  ;;  %p1004_p0 = scmp.lt.u32.totalorder %s1002_s26, %s997_s23 }
  0x28   : > { %p1006_p11 = scmp.lt.u32.totalorder %s997_s23, %s1321_s3 }
  0x29   : > { %p1001_p12 = pneg %p1000_p10  ;;  %p1005_p2 = por %p1004_p0, %p1003_p3 }
  0x2b   : > { %p1007_p4 = por %p1006_p11, %p1005_p2 }
  0x2d   : > { %p1008_p13 = pnand %p1007_p4, %p1001_p12 }
  0x2f   : > { %1011 = shalt.err (!%p1008_p13)
}
  0x30   : > { %s1012_s6 = scalar_lea.vmem %s1316_s21, 16384  ;;  %s1185_s20 = smov [#allocation2]  }
  0x31   : > { %p1013_p5 = scmp.ne.s32.totalorder %s1316_s21, %s1012_s6  ;;  %s1017_s25 = sshll.u32 %s1185_s20, 4  ;;  %s1018_s25 = int_to_ptr.vmem [resolvable:$false] %s1017_s25 }
  0x32   : > { %s1019_s2 = scalar_lea.vmem %s1018_s25, 32768  ;;  %p1020_p8 = scmp.lt.s32.totalorder %s1316_s21, %s1018_s25 }
  0x33   : > { %p1015_p10 = pnand %p1013_p5, %p999_p7  ;;  %p1021_p0 = scmp.lt.s32.totalorder %s1019_s2, %s1012_s6 }
  0x35   : > { %p1016_p9 = pneg %p1015_p10  ;;  %p1022_p3 = por %p1021_p0, %p1020_p8 }
  0x37   : > { %p1023_p2 = pnand %p1022_p3, %p1016_p9 }
  0x39   : > { %1026 = shalt.err (!%p1023_p2)
}
  0x3a   : > { %s1925_s23 = smov 128   ;;  %s1926_s12 = smov 8  }
  0x3b   : > { %895 = dma.hbm_to_vmem [thread:$0]  (!%p1327_p1), %s1321_s3, 16384, %s1316_s21, %s1332_s22, %s1925_s23, %s1925_s23, %s1926_s12  }
  0x3c   : > { %p175_p8 = scmp.lt.s32.totalorder %s1183_s19, 5  ;;  %p1938_p9 = scmp.ge.s32.totalorder %s1183_s19, 1 }
  0x3d   : > { %s68_s7 = sadd.s32 1, %s1151_s11  ;;  %p75_p13 = scmp.ne.s32.totalorder %s1151_s11, %s1147_s10 }
  0x3e   : > { %p1366_p11 = pnand %p1938_p9, %p175_p8  ;;  %p1940_p4 = scmp.eq.s32.totalorder %s1301_s30, 0 }
  0x3f   : > { %p1941_p7 = scmp.eq.s32.totalorder %s1183_s19, 0  ;;  %p81_p5 = scmp.ne.s32.totalorder %s1147_s10, %s1143_s9 }
  0x40   : > { %s1376_s8 = scalar_select %p1940_p4, %s1151_s11, %s68_s7  }
  0x41   : > { %p77_p12 = por %p75_p13, %p1941_p7  ;;  %s156_s6 = sand.u32 1, %s1151_s11  }
  0x42   : > { %s885_s24 = sshll.u32 %s1179_s18, 14  ;;  %p1386_p10 = por %p81_p5, %p1283_p6 }
  0x43   : > { %s872_s21 = sshll.u32 %s156_s6, 10  ;;  %s1393_s25 = scalar_lea.hbm %s1915_s1, %s885_s24 }
  0x44   : > { %s1942_s20 = scalar_select %p1386_p10, 1, 0 }
  0x45   : > { %p1943_p1 = scmp.lt.s32.totalorder %s1183_s19, 4  ;;  %s160_s27 = scalar_lea.vmem [#allocation5], %s872_s21 }
  0x46   : > { %s167_s30 = sshll.u32 %s160_s27, 4  ;;  %s1403_s2 = scalar_lea.sflag [#allocation6], %s156_s6  ;;  %s1401_s30 = int_to_ptr.vmem [resolvable:$true] %s167_s30 }
  0x47   : > { %p1397_p0 = pnand %p1943_p1, %p77_p12  ;;  %s1027_s7 = scalar_lea.hbm %s1393_s25, 16384 }
  0x48   : > { %p1028_p6 = scmp.ne.s32.totalorder %s1393_s25, %s1027_s7  ;;  %s1032_s22 = scalar_lea.hbm %s1915_s1, 32768 }
  0x49   : > { %p1029_p3 = pneg %p1397_p0  ;;  %p1033_p9 = scmp.lt.u32.totalorder %s1393_s25, %s1915_s1 }
  0x4a   : > { %p1034_p13 = scmp.lt.u32.totalorder %s1032_s22, %s1027_s7  ;;  %p1036_p7 = scmp.lt.u32.totalorder %s1027_s7, %s1393_s25 }
  0x4b   : > { %p1030_p2 = pnand %p1029_p3, %p1028_p6 }
  0x4c   : > { %p1035_p4 = por %p1034_p13, %p1033_p9 }
  0x4d   : > { %p1031_p8 = pneg %p1030_p2 }
  0x4e   : > { %p1037_p12 = por %p1036_p7, %p1035_p4 }
  0x50   : > { %p1038_p5 = pnand %p1037_p12, %p1031_p8 }
  0x52   : > { %1041 = shalt.err (!%p1038_p5)
}
  0x53   : > { %s1042_s6 = scalar_lea.vmem %s1401_s30, 16384  ;;  %s1188_s21 = smov [#allocation5]  }
  0x54   : > { %p1043_p1 = scmp.ne.s32.totalorder %s1401_s30, %s1042_s6  ;;  %s1047_s27 = sshll.u32 %s1188_s21, 4  ;;  %s1048_s27 = int_to_ptr.vmem [resolvable:$false] %s1047_s27 }
  0x55   : > { %s1049_s23 = scalar_lea.vmem %s1048_s27, 32768  ;;  %p1050_p10 = scmp.lt.s32.totalorder %s1401_s30, %s1048_s27 }
  0x56   : > { %p1045_p6 = pnand %p1043_p1, %p1029_p3  ;;  %p1051_p9 = scmp.lt.s32.totalorder %s1049_s23, %s1042_s6 }
  0x58   : > { %p1046_p2 = pneg %p1045_p6  ;;  %p1052_p13 = por %p1051_p9, %p1050_p10 }
  0x5a   : > { %p1053_p4 = pnand %p1052_p13, %p1046_p2 }
  0x5c   : > { %1056 = shalt.err (!%p1053_p4)
}
  0x5d   : > { %s1945_s12 = smov 8   ;;  %s1946_s7 = smov 128  }
  0x5e   : > { %898 = dma.hbm_to_vmem [thread:$0]  (!%p1397_p0), %s1393_s25, 16384, %s1401_s30, %s1403_s2, %s1946_s7, %s1946_s7, %s1945_s12  }
  0x5f   : > { %179 = sbr.rel (%p1366_p11) target bundleno = 228 (0xe4), region = 28  ;;  %s1437_s24 = sand.u32 (!%p1366_p11), 1, %s1159_s13  }
  0x60   : > { %s876_s3 = sshll.u32 (!%p1366_p11), %s1437_s24, 10  ;;  %s182_s22 = scalar_lea.sflag (!%p1366_p11), [#allocation3], %s1437_s24 }
  0x61   : > { %s1441_s6 = scalar_lea.vmem (!%p1366_p11), [#allocation2], %s876_s3  ;;  %p1947_p10 = scmp.ne.s32.totalorder (!%p1366_p11), %s1934_s28, 0 }
  0x66   : > { %1130 = dma.done.wait (%p1947_p10), %s182_s22, 16384  }
  0x67   : > { %1132 = vsyncadd (%p1947_p10), %s182_s22, 4294950912  ;;  %s190_s25 = sand.u32 1, %s1147_s10   ;;  %p1948_p11 = scmp.ne.s32.totalorder %s1942_s20, 0 }
  0x68   : > { %s877_s26 = sshll.u32 %s190_s25, 10  ;;  %s191_s9 = scalar_lea.sflag [#allocation6], %s190_s25 }
  0x69   : > { %s1448_s30 = scalar_lea.vmem [#allocation5], %s877_s26 }
  0x6a   : > { %1134 = dma.done.wait (%p1948_p11), %s191_s9, 16384  }
  0x6b   : > { %1136 = vsyncadd (%p1948_p11), %s191_s9, 4294950912  ;;  %v223_v0 = vld [vmem:[%s1441_s6] sm:$0xff]  ;;  %v224_v2 = vld [vmem:[%s1441_s6 + $0x8] sm:$0xff]  ;;  %s1463_s28 = scalar_lea.vmem [#allocation7], %s876_s3  ;;  %s880_s20 = sshll.u32 %s1171_s16, 7 }
  0x6c   : > { %v351_v1 = vld [vmem:[%s1448_s30] sm:$0xff]  ;;  %v352_v4 = vld [vmem:[%s1448_s30 + $0x8] sm:$0xff]  ;;  %v225_v5 = vld [vmem:[%s1441_s6 + $0x10] sm:$0xff]  ;;  %s881_s2 = sshll.u32 %s1167_s15, 8  ;;  %s751_s21 = sshll.u32 %s1463_s28, 4  ;;  %s1847_s21 = int_to_ptr.vmem [resolvable:$true] %s751_s21 }
  0x6d   : > { %v479_v3 = vadd.f32 %v351_v1, %v223_v0  ;;  %v353_v6 = vld [vmem:[%s1448_s30 + $0x10] sm:$0xff]  ;;  %v480_v7 = vadd.f32 %v352_v4, %v224_v2  ;;  %v226_v9 = vld [vmem:[%s1441_s6 + $0x18] sm:$0xff]  ;;  %v227_v11 = vld [vmem:[%s1441_s6 + $0x20] sm:$0xff]  ;;  %s1813_s15 = sadd.s32 %s881_s2, %s880_s20  ;;  %s1949_s12 = sld [smem:[#allocation14_spill]] }
  0x6e   : > { %v481_v8 = vadd.f32 %v353_v6, %v225_v5  ;;  %v354_v10 = vld [vmem:[%s1448_s30 + $0x18] sm:$0xff]  ;;  %v355_v13 = vld [vmem:[%s1448_s30 + $0x20] sm:$0xff]  ;;  %v228_v14 = vld [vmem:[%s1441_s6 + $0x28] sm:$0xff]  ;;  %s882_s16 = sshll.u32 %s1813_s15, 7  ;;  %s736_s22 = scalar_lea.sflag [#allocation4], %s1437_s24 }
  0x6f   : > { %607 = vst [vmem:[%s1463_s28] sm:$0xff] %v479_v3  ;;  %v482_v12 = vadd.f32 %v354_v10, %v226_v9  ;;  %v356_v15 = vld [vmem:[%s1448_s30 + $0x28] sm:$0xff]  ;;  %608 = vst [vmem:[%s1463_s28 + $0x8] sm:$0xff] %v480_v7  ;;  %v483_v16 = vadd.f32 %v355_v13, %v227_v11  ;;  %v229_v18 = vld [vmem:[%s1441_s6 + $0x30] sm:$0xff]  ;;  %p1951_p3 = scmp.ne.s32.totalorder %s1935_s29, 0  ;;  %s1189_s25 = smov [#allocation7]  }
  0x70   : > { %609 = vst [vmem:[%s1463_s28 + $0x10] sm:$0xff] %v481_v8  ;;  %v484_v17 = vadd.f32 %v356_v15, %v228_v14  ;;  %v357_v19 = vld [vmem:[%s1448_s30 + $0x30] sm:$0xff]  ;;  %v230_v20 = vld [vmem:[%s1441_s6 + $0x38] sm:$0xff]  ;;  %v231_v23 = vld [vmem:[%s1441_s6 + $0x40] sm:$0xff]  ;;  %s1061_s26 = sshll.u32 %s1189_s25, 4  ;;  %s1062_s26 = int_to_ptr.vmem [resolvable:$false] %s1061_s26 }
  0x71   : > { %610 = vst [vmem:[%s1463_s28 + $0x18] sm:$0xff] %v482_v12  ;;  %v485_v21 = vadd.f32 %v357_v19, %v229_v18  ;;  %v358_v22 = vld [vmem:[%s1448_s30 + $0x38] sm:$0xff]  ;;  %v359_v24 = vld [vmem:[%s1448_s30 + $0x40] sm:$0xff]  ;;  %611 = vst [vmem:[%s1463_s28 + $0x20] sm:$0xff] %v483_v16  ;;  %s1063_s9 = scalar_lea.vmem %s1062_s26, 32768  ;;  %p1064_p12 = scmp.lt.s32.totalorder %s1847_s21, %s1062_s26 }
  0x72   : > { %612 = vst [vmem:[%s1463_s28 + $0x28] sm:$0xff] %v484_v17  ;;  %v486_v25 = vadd.f32 %v358_v22, %v230_v20  ;;  %v487_v26 = vadd.f32 %v359_v24, %v231_v23  ;;  %v232_v27 = vld [vmem:[%s1441_s6 + $0x48] sm:$0xff]  ;;  %v233_v29 = vld [vmem:[%s1441_s6 + $0x50] sm:$0xff]  ;;  %v234_v32 = vld [vmem:[%s1441_s6 + $0x58] sm:$0xff] }
  0x73   : > { %v360_v28 = vld [vmem:[%s1448_s30 + $0x48] sm:$0xff]  ;;  %613 = vst [vmem:[%s1463_s28 + $0x30] sm:$0xff] %v485_v21  ;;  %v361_v31 = vld [vmem:[%s1448_s30 + $0x50] sm:$0xff]  ;;  %v362_v33 = vld [vmem:[%s1448_s30 + $0x58] sm:$0xff]  ;;  %s1950_s7 = smov %s1949_s12  ;;  %s1845_s3 = scalar_lea.hbm %s1949_s12, %s882_s16 }
  0x74   : > { %v488_v30 = vadd.f32 %v360_v28, %v232_v27  ;;  %614 = vst [vmem:[%s1463_s28 + $0x38] sm:$0xff] %v486_v25  ;;  %615 = vst [vmem:[%s1463_s28 + $0x40] sm:$0xff] %v487_v26  ;;  %v489_v34 = vadd.f32 %v361_v31, %v233_v29  ;;  %v490_v35 = vadd.f32 %v362_v33, %v234_v32  ;;  %v235_v36 = vld [vmem:[%s1441_s6 + $0x60] sm:$0xff]  ;;  %v236_v38 = vld [vmem:[%s1441_s6 + $0x68] sm:$0xff] }
  0x75   : > { %v363_v37 = vld [vmem:[%s1448_s30 + $0x60] sm:$0xff]  ;;  %v364_v40 = vld [vmem:[%s1448_s30 + $0x68] sm:$0xff]  ;;  %v237_v41 = vld [vmem:[%s1441_s6 + $0x70] sm:$0xff] }
  0x76   : > { %616 = vst [vmem:[%s1463_s28 + $0x48] sm:$0xff] %v488_v30  ;;  %v491_v39 = vadd.f32 %v363_v37, %v235_v36  ;;  %v365_v42 = vld [vmem:[%s1448_s30 + $0x70] sm:$0xff]  ;;  %617 = vst [vmem:[%s1463_s28 + $0x50] sm:$0xff] %v489_v34  ;;  %v492_v43 = vadd.f32 %v364_v40, %v236_v38  ;;  %v238_v45 = vld [vmem:[%s1441_s6 + $0x78] sm:$0xff] }
  0x77   : > { %618 = vst [vmem:[%s1463_s28 + $0x58] sm:$0xff] %v490_v35  ;;  %v493_v44 = vadd.f32 %v365_v42, %v237_v41  ;;  %v366_v46 = vld [vmem:[%s1448_s30 + $0x78] sm:$0xff]  ;;  %v239_v47 = vld [vmem:[%s1441_s6 + $0x80] sm:$0xff]  ;;  %v240_v50 = vld [vmem:[%s1441_s6 + $0x88] sm:$0xff] }
  0x78   : > { %619 = vst [vmem:[%s1463_s28 + $0x60] sm:$0xff] %v491_v39  ;;  %v494_v48 = vadd.f32 %v366_v46, %v238_v45  ;;  %v367_v49 = vld [vmem:[%s1448_s30 + $0x80] sm:$0xff]  ;;  %v368_v51 = vld [vmem:[%s1448_s30 + $0x88] sm:$0xff]  ;;  %620 = vst [vmem:[%s1463_s28 + $0x68] sm:$0xff] %v492_v43 }
  0x79   : > { %621 = vst [vmem:[%s1463_s28 + $0x70] sm:$0xff] %v493_v44  ;;  %v495_v52 = vadd.f32 %v367_v49, %v239_v47  ;;  %v496_v53 = vadd.f32 %v368_v51, %v240_v50  ;;  %v241_v54 = vld [vmem:[%s1441_s6 + $0x90] sm:$0xff]  ;;  %v242_v56 = vld [vmem:[%s1441_s6 + $0x98] sm:$0xff]  ;;  %v243_v59 = vld [vmem:[%s1441_s6 + $0xa0] sm:$0xff] }
  0x7a   : > { %v369_v55 = vld [vmem:[%s1448_s30 + $0x90] sm:$0xff]  ;;  %622 = vst [vmem:[%s1463_s28 + $0x78] sm:$0xff] %v494_v48  ;;  %v370_v58 = vld [vmem:[%s1448_s30 + $0x98] sm:$0xff]  ;;  %v371_v60 = vld [vmem:[%s1448_s30 + $0xa0] sm:$0xff] }
  0x7b   : > { %v497_v57 = vadd.f32 %v369_v55, %v241_v54  ;;  %623 = vst [vmem:[%s1463_s28 + $0x80] sm:$0xff] %v495_v52  ;;  %624 = vst [vmem:[%s1463_s28 + $0x88] sm:$0xff] %v496_v53  ;;  %v498_v61 = vadd.f32 %v370_v58, %v242_v56  ;;  %v499_v62 = vadd.f32 %v371_v60, %v243_v59  ;;  %v244_v63 = vld [vmem:[%s1441_s6 + $0xa8] sm:$0xff]  ;;  %v245_v1 = vld [vmem:[%s1441_s6 + $0xb0] sm:$0xff] }
  0x7c   : > { %v372_v0 = vld [vmem:[%s1448_s30 + $0xa8] sm:$0xff]  ;;  %v373_v3 = vld [vmem:[%s1448_s30 + $0xb0] sm:$0xff]  ;;  %v246_v4 = vld [vmem:[%s1441_s6 + $0xb8] sm:$0xff] }
  0x7d   : > { %625 = vst [vmem:[%s1463_s28 + $0x90] sm:$0xff] %v497_v57  ;;  %v500_v2 = vadd.f32 %v372_v0, %v244_v63  ;;  %v374_v5 = vld [vmem:[%s1448_s30 + $0xb8] sm:$0xff]  ;;  %626 = vst [vmem:[%s1463_s28 + $0x98] sm:$0xff] %v498_v61  ;;  %v501_v6 = vadd.f32 %v373_v3, %v245_v1  ;;  %v247_v8 = vld [vmem:[%s1441_s6 + $0xc0] sm:$0xff] }
  0x7e   : > { %627 = vst [vmem:[%s1463_s28 + $0xa0] sm:$0xff] %v499_v62  ;;  %v502_v7 = vadd.f32 %v374_v5, %v246_v4  ;;  %v375_v9 = vld [vmem:[%s1448_s30 + $0xc0] sm:$0xff]  ;;  %v248_v10 = vld [vmem:[%s1441_s6 + $0xc8] sm:$0xff]  ;;  %v249_v13 = vld [vmem:[%s1441_s6 + $0xd0] sm:$0xff] }
  0x7f   : > { %628 = vst [vmem:[%s1463_s28 + $0xa8] sm:$0xff] %v500_v2  ;;  %v503_v11 = vadd.f32 %v375_v9, %v247_v8  ;;  %v376_v12 = vld [vmem:[%s1448_s30 + $0xc8] sm:$0xff]  ;;  %v377_v14 = vld [vmem:[%s1448_s30 + $0xd0] sm:$0xff]  ;;  %629 = vst [vmem:[%s1463_s28 + $0xb0] sm:$0xff] %v501_v6 }
  0x80   : > { %630 = vst [vmem:[%s1463_s28 + $0xb8] sm:$0xff] %v502_v7  ;;  %v504_v15 = vadd.f32 %v376_v12, %v248_v10  ;;  %v505_v16 = vadd.f32 %v377_v14, %v249_v13  ;;  %v250_v17 = vld [vmem:[%s1441_s6 + $0xd8] sm:$0xff]  ;;  %v251_v19 = vld [vmem:[%s1441_s6 + $0xe0] sm:$0xff]  ;;  %v252_v22 = vld [vmem:[%s1441_s6 + $0xe8] sm:$0xff] }
  0x81   : > { %v378_v18 = vld [vmem:[%s1448_s30 + $0xd8] sm:$0xff]  ;;  %631 = vst [vmem:[%s1463_s28 + $0xc0] sm:$0xff] %v503_v11  ;;  %v379_v21 = vld [vmem:[%s1448_s30 + $0xe0] sm:$0xff]  ;;  %v380_v23 = vld [vmem:[%s1448_s30 + $0xe8] sm:$0xff] }
  0x82   : > { %v506_v20 = vadd.f32 %v378_v18, %v250_v17  ;;  %632 = vst [vmem:[%s1463_s28 + $0xc8] sm:$0xff] %v504_v15  ;;  %633 = vst [vmem:[%s1463_s28 + $0xd0] sm:$0xff] %v505_v16  ;;  %v507_v24 = vadd.f32 %v379_v21, %v251_v19  ;;  %v508_v25 = vadd.f32 %v380_v23, %v252_v22  ;;  %v253_v26 = vld [vmem:[%s1441_s6 + $0xf0] sm:$0xff]  ;;  %v254_v28 = vld [vmem:[%s1441_s6 + $0xf8] sm:$0xff] }
  0x83   : > { %v381_v27 = vld [vmem:[%s1448_s30 + $0xf0] sm:$0xff]  ;;  %v382_v30 = vld [vmem:[%s1448_s30 + $0xf8] sm:$0xff]  ;;  %v255_v31 = vld [vmem:[%s1441_s6 + $0x100] sm:$0xff] }
  0x84   : > { %634 = vst [vmem:[%s1463_s28 + $0xd8] sm:$0xff] %v506_v20  ;;  %v509_v29 = vadd.f32 %v381_v27, %v253_v26  ;;  %v383_v32 = vld [vmem:[%s1448_s30 + $0x100] sm:$0xff]  ;;  %635 = vst [vmem:[%s1463_s28 + $0xe0] sm:$0xff] %v507_v24  ;;  %v510_v33 = vadd.f32 %v382_v30, %v254_v28  ;;  %v256_v35 = vld [vmem:[%s1441_s6 + $0x108] sm:$0xff] }
  0x85   : > { %636 = vst [vmem:[%s1463_s28 + $0xe8] sm:$0xff] %v508_v25  ;;  %v511_v34 = vadd.f32 %v383_v32, %v255_v31  ;;  %v384_v36 = vld [vmem:[%s1448_s30 + $0x108] sm:$0xff]  ;;  %v257_v37 = vld [vmem:[%s1441_s6 + $0x110] sm:$0xff]  ;;  %v258_v40 = vld [vmem:[%s1441_s6 + $0x118] sm:$0xff] }
  0x86   : > { %637 = vst [vmem:[%s1463_s28 + $0xf0] sm:$0xff] %v509_v29  ;;  %v512_v38 = vadd.f32 %v384_v36, %v256_v35  ;;  %v385_v39 = vld [vmem:[%s1448_s30 + $0x110] sm:$0xff]  ;;  %v386_v41 = vld [vmem:[%s1448_s30 + $0x118] sm:$0xff]  ;;  %638 = vst [vmem:[%s1463_s28 + $0xf8] sm:$0xff] %v510_v33 }
  0x87   : > { %639 = vst [vmem:[%s1463_s28 + $0x100] sm:$0xff] %v511_v34  ;;  %v513_v42 = vadd.f32 %v385_v39, %v257_v37  ;;  %v514_v43 = vadd.f32 %v386_v41, %v258_v40  ;;  %v259_v44 = vld [vmem:[%s1441_s6 + $0x120] sm:$0xff]  ;;  %v260_v46 = vld [vmem:[%s1441_s6 + $0x128] sm:$0xff]  ;;  %v261_v49 = vld [vmem:[%s1441_s6 + $0x130] sm:$0xff] }
  0x88   : > { %v387_v45 = vld [vmem:[%s1448_s30 + $0x120] sm:$0xff]  ;;  %640 = vst [vmem:[%s1463_s28 + $0x108] sm:$0xff] %v512_v38  ;;  %v388_v48 = vld [vmem:[%s1448_s30 + $0x128] sm:$0xff]  ;;  %v389_v50 = vld [vmem:[%s1448_s30 + $0x130] sm:$0xff] }
  0x89   : > { %v515_v47 = vadd.f32 %v387_v45, %v259_v44  ;;  %641 = vst [vmem:[%s1463_s28 + $0x110] sm:$0xff] %v513_v42  ;;  %642 = vst [vmem:[%s1463_s28 + $0x118] sm:$0xff] %v514_v43  ;;  %v516_v51 = vadd.f32 %v388_v48, %v260_v46  ;;  %v517_v52 = vadd.f32 %v389_v50, %v261_v49  ;;  %v262_v53 = vld [vmem:[%s1441_s6 + $0x138] sm:$0xff]  ;;  %v263_v55 = vld [vmem:[%s1441_s6 + $0x140] sm:$0xff] }
  0x8a   : > { %v390_v54 = vld [vmem:[%s1448_s30 + $0x138] sm:$0xff]  ;;  %v391_v57 = vld [vmem:[%s1448_s30 + $0x140] sm:$0xff]  ;;  %v264_v58 = vld [vmem:[%s1441_s6 + $0x148] sm:$0xff] }
  0x8b   : > { %643 = vst [vmem:[%s1463_s28 + $0x120] sm:$0xff] %v515_v47  ;;  %v518_v56 = vadd.f32 %v390_v54, %v262_v53  ;;  %v392_v59 = vld [vmem:[%s1448_s30 + $0x148] sm:$0xff]  ;;  %644 = vst [vmem:[%s1463_s28 + $0x128] sm:$0xff] %v516_v51  ;;  %v519_v60 = vadd.f32 %v391_v57, %v263_v55  ;;  %v265_v62 = vld [vmem:[%s1441_s6 + $0x150] sm:$0xff] }
  0x8c   : > { %645 = vst [vmem:[%s1463_s28 + $0x130] sm:$0xff] %v517_v52  ;;  %v520_v61 = vadd.f32 %v392_v59, %v264_v58  ;;  %v393_v63 = vld [vmem:[%s1448_s30 + $0x150] sm:$0xff]  ;;  %v266_v0 = vld [vmem:[%s1441_s6 + $0x158] sm:$0xff]  ;;  %v267_v3 = vld [vmem:[%s1441_s6 + $0x160] sm:$0xff] }
  0x8d   : > { %646 = vst [vmem:[%s1463_s28 + $0x138] sm:$0xff] %v518_v56  ;;  %v521_v1 = vadd.f32 %v393_v63, %v265_v62  ;;  %v394_v2 = vld [vmem:[%s1448_s30 + $0x158] sm:$0xff]  ;;  %v395_v4 = vld [vmem:[%s1448_s30 + $0x160] sm:$0xff]  ;;  %647 = vst [vmem:[%s1463_s28 + $0x140] sm:$0xff] %v519_v60 }
  0x8e   : > { %648 = vst [vmem:[%s1463_s28 + $0x148] sm:$0xff] %v520_v61  ;;  %v522_v5 = vadd.f32 %v394_v2, %v266_v0  ;;  %v523_v6 = vadd.f32 %v395_v4, %v267_v3  ;;  %v268_v7 = vld [vmem:[%s1441_s6 + $0x168] sm:$0xff]  ;;  %v269_v9 = vld [vmem:[%s1441_s6 + $0x170] sm:$0xff]  ;;  %v270_v12 = vld [vmem:[%s1441_s6 + $0x178] sm:$0xff] }
  0x8f   : > { %v396_v8 = vld [vmem:[%s1448_s30 + $0x168] sm:$0xff]  ;;  %649 = vst [vmem:[%s1463_s28 + $0x150] sm:$0xff] %v521_v1  ;;  %v397_v11 = vld [vmem:[%s1448_s30 + $0x170] sm:$0xff]  ;;  %v398_v13 = vld [vmem:[%s1448_s30 + $0x178] sm:$0xff] }
  0x90   : > { %v524_v10 = vadd.f32 %v396_v8, %v268_v7  ;;  %650 = vst [vmem:[%s1463_s28 + $0x158] sm:$0xff] %v522_v5  ;;  %651 = vst [vmem:[%s1463_s28 + $0x160] sm:$0xff] %v523_v6  ;;  %v525_v14 = vadd.f32 %v397_v11, %v269_v9  ;;  %v526_v15 = vadd.f32 %v398_v13, %v270_v12  ;;  %v271_v16 = vld [vmem:[%s1441_s6 + $0x180] sm:$0xff]  ;;  %v272_v18 = vld [vmem:[%s1441_s6 + $0x188] sm:$0xff] }
  0x91   : > { %v399_v17 = vld [vmem:[%s1448_s30 + $0x180] sm:$0xff]  ;;  %v400_v20 = vld [vmem:[%s1448_s30 + $0x188] sm:$0xff]  ;;  %v273_v21 = vld [vmem:[%s1441_s6 + $0x190] sm:$0xff] }
  0x92   : > { %652 = vst [vmem:[%s1463_s28 + $0x168] sm:$0xff] %v524_v10  ;;  %v527_v19 = vadd.f32 %v399_v17, %v271_v16  ;;  %v401_v22 = vld [vmem:[%s1448_s30 + $0x190] sm:$0xff]  ;;  %653 = vst [vmem:[%s1463_s28 + $0x170] sm:$0xff] %v525_v14  ;;  %v528_v23 = vadd.f32 %v400_v20, %v272_v18  ;;  %v274_v25 = vld [vmem:[%s1441_s6 + $0x198] sm:$0xff] }
  0x93   : > { %654 = vst [vmem:[%s1463_s28 + $0x178] sm:$0xff] %v526_v15  ;;  %v529_v24 = vadd.f32 %v401_v22, %v273_v21  ;;  %v402_v26 = vld [vmem:[%s1448_s30 + $0x198] sm:$0xff]  ;;  %v275_v27 = vld [vmem:[%s1441_s6 + $0x1a0] sm:$0xff]  ;;  %v276_v30 = vld [vmem:[%s1441_s6 + $0x1a8] sm:$0xff] }
  0x94   : > { %655 = vst [vmem:[%s1463_s28 + $0x180] sm:$0xff] %v527_v19  ;;  %v530_v28 = vadd.f32 %v402_v26, %v274_v25  ;;  %v403_v29 = vld [vmem:[%s1448_s30 + $0x1a0] sm:$0xff]  ;;  %v404_v31 = vld [vmem:[%s1448_s30 + $0x1a8] sm:$0xff]  ;;  %656 = vst [vmem:[%s1463_s28 + $0x188] sm:$0xff] %v528_v23 }
  0x95   : > { %657 = vst [vmem:[%s1463_s28 + $0x190] sm:$0xff] %v529_v24  ;;  %v531_v32 = vadd.f32 %v403_v29, %v275_v27  ;;  %v532_v33 = vadd.f32 %v404_v31, %v276_v30  ;;  %v277_v34 = vld [vmem:[%s1441_s6 + $0x1b0] sm:$0xff]  ;;  %v278_v36 = vld [vmem:[%s1441_s6 + $0x1b8] sm:$0xff]  ;;  %v279_v39 = vld [vmem:[%s1441_s6 + $0x1c0] sm:$0xff] }
  0x96   : > { %v405_v35 = vld [vmem:[%s1448_s30 + $0x1b0] sm:$0xff]  ;;  %658 = vst [vmem:[%s1463_s28 + $0x198] sm:$0xff] %v530_v28  ;;  %v406_v38 = vld [vmem:[%s1448_s30 + $0x1b8] sm:$0xff]  ;;  %v407_v40 = vld [vmem:[%s1448_s30 + $0x1c0] sm:$0xff] }
  0x97   : > { %v533_v37 = vadd.f32 %v405_v35, %v277_v34  ;;  %659 = vst [vmem:[%s1463_s28 + $0x1a0] sm:$0xff] %v531_v32  ;;  %660 = vst [vmem:[%s1463_s28 + $0x1a8] sm:$0xff] %v532_v33  ;;  %v534_v41 = vadd.f32 %v406_v38, %v278_v36  ;;  %v535_v42 = vadd.f32 %v407_v40, %v279_v39  ;;  %v280_v43 = vld [vmem:[%s1441_s6 + $0x1c8] sm:$0xff]  ;;  %v281_v45 = vld [vmem:[%s1441_s6 + $0x1d0] sm:$0xff] }
  0x98   : > { %v408_v44 = vld [vmem:[%s1448_s30 + $0x1c8] sm:$0xff]  ;;  %v409_v47 = vld [vmem:[%s1448_s30 + $0x1d0] sm:$0xff]  ;;  %v282_v48 = vld [vmem:[%s1441_s6 + $0x1d8] sm:$0xff] }
  0x99   : > { %661 = vst [vmem:[%s1463_s28 + $0x1b0] sm:$0xff] %v533_v37  ;;  %v536_v46 = vadd.f32 %v408_v44, %v280_v43  ;;  %v410_v49 = vld [vmem:[%s1448_s30 + $0x1d8] sm:$0xff]  ;;  %662 = vst [vmem:[%s1463_s28 + $0x1b8] sm:$0xff] %v534_v41  ;;  %v537_v50 = vadd.f32 %v409_v47, %v281_v45  ;;  %v283_v52 = vld [vmem:[%s1441_s6 + $0x1e0] sm:$0xff] }
  0x9a   : > { %663 = vst [vmem:[%s1463_s28 + $0x1c0] sm:$0xff] %v535_v42  ;;  %v538_v51 = vadd.f32 %v410_v49, %v282_v48  ;;  %v411_v53 = vld [vmem:[%s1448_s30 + $0x1e0] sm:$0xff]  ;;  %v284_v54 = vld [vmem:[%s1441_s6 + $0x1e8] sm:$0xff]  ;;  %v285_v57 = vld [vmem:[%s1441_s6 + $0x1f0] sm:$0xff] }
  0x9b   : > { %664 = vst [vmem:[%s1463_s28 + $0x1c8] sm:$0xff] %v536_v46  ;;  %v539_v55 = vadd.f32 %v411_v53, %v283_v52  ;;  %v412_v56 = vld [vmem:[%s1448_s30 + $0x1e8] sm:$0xff]  ;;  %v413_v58 = vld [vmem:[%s1448_s30 + $0x1f0] sm:$0xff]  ;;  %665 = vst [vmem:[%s1463_s28 + $0x1d0] sm:$0xff] %v537_v50 }
  0x9c   : > { %666 = vst [vmem:[%s1463_s28 + $0x1d8] sm:$0xff] %v538_v51  ;;  %v540_v59 = vadd.f32 %v412_v56, %v284_v54  ;;  %v541_v60 = vadd.f32 %v413_v58, %v285_v57  ;;  %v286_v61 = vld [vmem:[%s1441_s6 + $0x1f8] sm:$0xff]  ;;  %v287_v63 = vld [vmem:[%s1441_s6 + $0x200] sm:$0xff]  ;;  %v288_v2 = vld [vmem:[%s1441_s6 + $0x208] sm:$0xff] }
  0x9d   : > { %v414_v62 = vld [vmem:[%s1448_s30 + $0x1f8] sm:$0xff]  ;;  %667 = vst [vmem:[%s1463_s28 + $0x1e0] sm:$0xff] %v539_v55  ;;  %v415_v1 = vld [vmem:[%s1448_s30 + $0x200] sm:$0xff]  ;;  %v416_v3 = vld [vmem:[%s1448_s30 + $0x208] sm:$0xff] }
  0x9e   : > { %v542_v0 = vadd.f32 %v414_v62, %v286_v61  ;;  %668 = vst [vmem:[%s1463_s28 + $0x1e8] sm:$0xff] %v540_v59  ;;  %669 = vst [vmem:[%s1463_s28 + $0x1f0] sm:$0xff] %v541_v60  ;;  %v543_v4 = vadd.f32 %v415_v1, %v287_v63  ;;  %v544_v5 = vadd.f32 %v416_v3, %v288_v2  ;;  %v289_v6 = vld [vmem:[%s1441_s6 + $0x210] sm:$0xff]  ;;  %v290_v8 = vld [vmem:[%s1441_s6 + $0x218] sm:$0xff] }
  0x9f   : > { %v417_v7 = vld [vmem:[%s1448_s30 + $0x210] sm:$0xff]  ;;  %v418_v10 = vld [vmem:[%s1448_s30 + $0x218] sm:$0xff]  ;;  %v291_v11 = vld [vmem:[%s1441_s6 + $0x220] sm:$0xff] }
  0xa0   : > { %670 = vst [vmem:[%s1463_s28 + $0x1f8] sm:$0xff] %v542_v0  ;;  %v545_v9 = vadd.f32 %v417_v7, %v289_v6  ;;  %v419_v12 = vld [vmem:[%s1448_s30 + $0x220] sm:$0xff]  ;;  %671 = vst [vmem:[%s1463_s28 + $0x200] sm:$0xff] %v543_v4  ;;  %v546_v13 = vadd.f32 %v418_v10, %v290_v8  ;;  %v292_v15 = vld [vmem:[%s1441_s6 + $0x228] sm:$0xff] }
  0xa1   : > { %672 = vst [vmem:[%s1463_s28 + $0x208] sm:$0xff] %v544_v5  ;;  %v547_v14 = vadd.f32 %v419_v12, %v291_v11  ;;  %v420_v16 = vld [vmem:[%s1448_s30 + $0x228] sm:$0xff]  ;;  %v293_v17 = vld [vmem:[%s1441_s6 + $0x230] sm:$0xff]  ;;  %v294_v20 = vld [vmem:[%s1441_s6 + $0x238] sm:$0xff] }
  0xa2   : > { %673 = vst [vmem:[%s1463_s28 + $0x210] sm:$0xff] %v545_v9  ;;  %v548_v18 = vadd.f32 %v420_v16, %v292_v15  ;;  %v421_v19 = vld [vmem:[%s1448_s30 + $0x230] sm:$0xff]  ;;  %v422_v21 = vld [vmem:[%s1448_s30 + $0x238] sm:$0xff]  ;;  %674 = vst [vmem:[%s1463_s28 + $0x218] sm:$0xff] %v546_v13 }
  0xa3   : > { %675 = vst [vmem:[%s1463_s28 + $0x220] sm:$0xff] %v547_v14  ;;  %v549_v22 = vadd.f32 %v421_v19, %v293_v17  ;;  %v550_v23 = vadd.f32 %v422_v21, %v294_v20  ;;  %v295_v24 = vld [vmem:[%s1441_s6 + $0x240] sm:$0xff]  ;;  %v296_v26 = vld [vmem:[%s1441_s6 + $0x248] sm:$0xff]  ;;  %v297_v29 = vld [vmem:[%s1441_s6 + $0x250] sm:$0xff] }
  0xa4   : > { %v423_v25 = vld [vmem:[%s1448_s30 + $0x240] sm:$0xff]  ;;  %676 = vst [vmem:[%s1463_s28 + $0x228] sm:$0xff] %v548_v18  ;;  %v424_v28 = vld [vmem:[%s1448_s30 + $0x248] sm:$0xff]  ;;  %v425_v30 = vld [vmem:[%s1448_s30 + $0x250] sm:$0xff] }
  0xa5   : > { %v551_v27 = vadd.f32 %v423_v25, %v295_v24  ;;  %677 = vst [vmem:[%s1463_s28 + $0x230] sm:$0xff] %v549_v22  ;;  %678 = vst [vmem:[%s1463_s28 + $0x238] sm:$0xff] %v550_v23  ;;  %v552_v31 = vadd.f32 %v424_v28, %v296_v26  ;;  %v553_v32 = vadd.f32 %v425_v30, %v297_v29  ;;  %v298_v33 = vld [vmem:[%s1441_s6 + $0x258] sm:$0xff]  ;;  %v299_v35 = vld [vmem:[%s1441_s6 + $0x260] sm:$0xff] }
  0xa6   : > { %v426_v34 = vld [vmem:[%s1448_s30 + $0x258] sm:$0xff]  ;;  %v427_v37 = vld [vmem:[%s1448_s30 + $0x260] sm:$0xff]  ;;  %v300_v38 = vld [vmem:[%s1441_s6 + $0x268] sm:$0xff] }
  0xa7   : > { %679 = vst [vmem:[%s1463_s28 + $0x240] sm:$0xff] %v551_v27  ;;  %v554_v36 = vadd.f32 %v426_v34, %v298_v33  ;;  %v428_v39 = vld [vmem:[%s1448_s30 + $0x268] sm:$0xff]  ;;  %680 = vst [vmem:[%s1463_s28 + $0x248] sm:$0xff] %v552_v31  ;;  %v555_v40 = vadd.f32 %v427_v37, %v299_v35  ;;  %v301_v42 = vld [vmem:[%s1441_s6 + $0x270] sm:$0xff] }
  0xa8   : > { %681 = vst [vmem:[%s1463_s28 + $0x250] sm:$0xff] %v553_v32  ;;  %v556_v41 = vadd.f32 %v428_v39, %v300_v38  ;;  %v429_v43 = vld [vmem:[%s1448_s30 + $0x270] sm:$0xff]  ;;  %v302_v44 = vld [vmem:[%s1441_s6 + $0x278] sm:$0xff]  ;;  %v303_v47 = vld [vmem:[%s1441_s6 + $0x280] sm:$0xff] }
  0xa9   : > { %682 = vst [vmem:[%s1463_s28 + $0x258] sm:$0xff] %v554_v36  ;;  %v557_v45 = vadd.f32 %v429_v43, %v301_v42  ;;  %v430_v46 = vld [vmem:[%s1448_s30 + $0x278] sm:$0xff]  ;;  %v431_v48 = vld [vmem:[%s1448_s30 + $0x280] sm:$0xff]  ;;  %683 = vst [vmem:[%s1463_s28 + $0x260] sm:$0xff] %v555_v40 }
  0xaa   : > { %684 = vst [vmem:[%s1463_s28 + $0x268] sm:$0xff] %v556_v41  ;;  %v558_v49 = vadd.f32 %v430_v46, %v302_v44  ;;  %v559_v50 = vadd.f32 %v431_v48, %v303_v47  ;;  %v304_v51 = vld [vmem:[%s1441_s6 + $0x288] sm:$0xff]  ;;  %v305_v53 = vld [vmem:[%s1441_s6 + $0x290] sm:$0xff]  ;;  %v306_v56 = vld [vmem:[%s1441_s6 + $0x298] sm:$0xff] }
  0xab   : > { %v432_v52 = vld [vmem:[%s1448_s30 + $0x288] sm:$0xff]  ;;  %685 = vst [vmem:[%s1463_s28 + $0x270] sm:$0xff] %v557_v45  ;;  %v433_v55 = vld [vmem:[%s1448_s30 + $0x290] sm:$0xff]  ;;  %v434_v57 = vld [vmem:[%s1448_s30 + $0x298] sm:$0xff] }
  0xac   : > { %v560_v54 = vadd.f32 %v432_v52, %v304_v51  ;;  %686 = vst [vmem:[%s1463_s28 + $0x278] sm:$0xff] %v558_v49  ;;  %687 = vst [vmem:[%s1463_s28 + $0x280] sm:$0xff] %v559_v50  ;;  %v561_v58 = vadd.f32 %v433_v55, %v305_v53  ;;  %v562_v59 = vadd.f32 %v434_v57, %v306_v56  ;;  %v307_v60 = vld [vmem:[%s1441_s6 + $0x2a0] sm:$0xff]  ;;  %v308_v62 = vld [vmem:[%s1441_s6 + $0x2a8] sm:$0xff] }
  0xad   : > { %v435_v61 = vld [vmem:[%s1448_s30 + $0x2a0] sm:$0xff]  ;;  %v436_v0 = vld [vmem:[%s1448_s30 + $0x2a8] sm:$0xff]  ;;  %v309_v1 = vld [vmem:[%s1441_s6 + $0x2b0] sm:$0xff] }
  0xae   : > { %688 = vst [vmem:[%s1463_s28 + $0x288] sm:$0xff] %v560_v54  ;;  %v563_v63 = vadd.f32 %v435_v61, %v307_v60  ;;  %v437_v2 = vld [vmem:[%s1448_s30 + $0x2b0] sm:$0xff]  ;;  %689 = vst [vmem:[%s1463_s28 + $0x290] sm:$0xff] %v561_v58  ;;  %v564_v3 = vadd.f32 %v436_v0, %v308_v62  ;;  %v310_v5 = vld [vmem:[%s1441_s6 + $0x2b8] sm:$0xff] }
  0xaf   : > { %690 = vst [vmem:[%s1463_s28 + $0x298] sm:$0xff] %v562_v59  ;;  %v565_v4 = vadd.f32 %v437_v2, %v309_v1  ;;  %v438_v6 = vld [vmem:[%s1448_s30 + $0x2b8] sm:$0xff]  ;;  %v311_v7 = vld [vmem:[%s1441_s6 + $0x2c0] sm:$0xff]  ;;  %v312_v10 = vld [vmem:[%s1441_s6 + $0x2c8] sm:$0xff] }
  0xb0   : > { %691 = vst [vmem:[%s1463_s28 + $0x2a0] sm:$0xff] %v563_v63  ;;  %v566_v8 = vadd.f32 %v438_v6, %v310_v5  ;;  %v439_v9 = vld [vmem:[%s1448_s30 + $0x2c0] sm:$0xff]  ;;  %v440_v11 = vld [vmem:[%s1448_s30 + $0x2c8] sm:$0xff]  ;;  %692 = vst [vmem:[%s1463_s28 + $0x2a8] sm:$0xff] %v564_v3 }
  0xb1   : > { %693 = vst [vmem:[%s1463_s28 + $0x2b0] sm:$0xff] %v565_v4  ;;  %v567_v12 = vadd.f32 %v439_v9, %v311_v7  ;;  %v568_v13 = vadd.f32 %v440_v11, %v312_v10  ;;  %v313_v14 = vld [vmem:[%s1441_s6 + $0x2d0] sm:$0xff]  ;;  %v314_v16 = vld [vmem:[%s1441_s6 + $0x2d8] sm:$0xff]  ;;  %v315_v19 = vld [vmem:[%s1441_s6 + $0x2e0] sm:$0xff] }
  0xb2   : > { %v441_v15 = vld [vmem:[%s1448_s30 + $0x2d0] sm:$0xff]  ;;  %694 = vst [vmem:[%s1463_s28 + $0x2b8] sm:$0xff] %v566_v8  ;;  %v442_v18 = vld [vmem:[%s1448_s30 + $0x2d8] sm:$0xff]  ;;  %v443_v20 = vld [vmem:[%s1448_s30 + $0x2e0] sm:$0xff] }
  0xb3   : > { %v569_v17 = vadd.f32 %v441_v15, %v313_v14  ;;  %695 = vst [vmem:[%s1463_s28 + $0x2c0] sm:$0xff] %v567_v12  ;;  %696 = vst [vmem:[%s1463_s28 + $0x2c8] sm:$0xff] %v568_v13  ;;  %v570_v21 = vadd.f32 %v442_v18, %v314_v16  ;;  %v571_v22 = vadd.f32 %v443_v20, %v315_v19  ;;  %v316_v23 = vld [vmem:[%s1441_s6 + $0x2e8] sm:$0xff]  ;;  %v317_v25 = vld [vmem:[%s1441_s6 + $0x2f0] sm:$0xff] }
  0xb4   : > { %v444_v24 = vld [vmem:[%s1448_s30 + $0x2e8] sm:$0xff]  ;;  %v445_v27 = vld [vmem:[%s1448_s30 + $0x2f0] sm:$0xff]  ;;  %v318_v28 = vld [vmem:[%s1441_s6 + $0x2f8] sm:$0xff] }
  0xb5   : > { %697 = vst [vmem:[%s1463_s28 + $0x2d0] sm:$0xff] %v569_v17  ;;  %v572_v26 = vadd.f32 %v444_v24, %v316_v23  ;;  %v446_v29 = vld [vmem:[%s1448_s30 + $0x2f8] sm:$0xff]  ;;  %698 = vst [vmem:[%s1463_s28 + $0x2d8] sm:$0xff] %v570_v21  ;;  %v573_v30 = vadd.f32 %v445_v27, %v317_v25  ;;  %v319_v32 = vld [vmem:[%s1441_s6 + $0x300] sm:$0xff] }
  0xb6   : > { %699 = vst [vmem:[%s1463_s28 + $0x2e0] sm:$0xff] %v571_v22  ;;  %v574_v31 = vadd.f32 %v446_v29, %v318_v28  ;;  %v447_v33 = vld [vmem:[%s1448_s30 + $0x300] sm:$0xff]  ;;  %v320_v34 = vld [vmem:[%s1441_s6 + $0x308] sm:$0xff]  ;;  %v321_v37 = vld [vmem:[%s1441_s6 + $0x310] sm:$0xff] }
  0xb7   : > { %700 = vst [vmem:[%s1463_s28 + $0x2e8] sm:$0xff] %v572_v26  ;;  %v575_v35 = vadd.f32 %v447_v33, %v319_v32  ;;  %v448_v36 = vld [vmem:[%s1448_s30 + $0x308] sm:$0xff]  ;;  %v449_v38 = vld [vmem:[%s1448_s30 + $0x310] sm:$0xff]  ;;  %701 = vst [vmem:[%s1463_s28 + $0x2f0] sm:$0xff] %v573_v30 }
  0xb8   : > { %702 = vst [vmem:[%s1463_s28 + $0x2f8] sm:$0xff] %v574_v31  ;;  %v576_v39 = vadd.f32 %v448_v36, %v320_v34  ;;  %v577_v40 = vadd.f32 %v449_v38, %v321_v37  ;;  %v322_v41 = vld [vmem:[%s1441_s6 + $0x318] sm:$0xff]  ;;  %v323_v43 = vld [vmem:[%s1441_s6 + $0x320] sm:$0xff]  ;;  %v324_v46 = vld [vmem:[%s1441_s6 + $0x328] sm:$0xff] }
  0xb9   : > { %v450_v42 = vld [vmem:[%s1448_s30 + $0x318] sm:$0xff]  ;;  %703 = vst [vmem:[%s1463_s28 + $0x300] sm:$0xff] %v575_v35  ;;  %v451_v45 = vld [vmem:[%s1448_s30 + $0x320] sm:$0xff]  ;;  %v452_v47 = vld [vmem:[%s1448_s30 + $0x328] sm:$0xff] }
  0xba   : > { %v578_v44 = vadd.f32 %v450_v42, %v322_v41  ;;  %704 = vst [vmem:[%s1463_s28 + $0x308] sm:$0xff] %v576_v39  ;;  %705 = vst [vmem:[%s1463_s28 + $0x310] sm:$0xff] %v577_v40  ;;  %v579_v48 = vadd.f32 %v451_v45, %v323_v43  ;;  %v580_v49 = vadd.f32 %v452_v47, %v324_v46  ;;  %v325_v50 = vld [vmem:[%s1441_s6 + $0x330] sm:$0xff]  ;;  %v326_v52 = vld [vmem:[%s1441_s6 + $0x338] sm:$0xff] }
  0xbb   : > { %v453_v51 = vld [vmem:[%s1448_s30 + $0x330] sm:$0xff]  ;;  %v454_v54 = vld [vmem:[%s1448_s30 + $0x338] sm:$0xff]  ;;  %v327_v55 = vld [vmem:[%s1441_s6 + $0x340] sm:$0xff] }
  0xbc   : > { %706 = vst [vmem:[%s1463_s28 + $0x318] sm:$0xff] %v578_v44  ;;  %v581_v53 = vadd.f32 %v453_v51, %v325_v50  ;;  %v455_v56 = vld [vmem:[%s1448_s30 + $0x340] sm:$0xff]  ;;  %707 = vst [vmem:[%s1463_s28 + $0x320] sm:$0xff] %v579_v48  ;;  %v582_v57 = vadd.f32 %v454_v54, %v326_v52  ;;  %v328_v59 = vld [vmem:[%s1441_s6 + $0x348] sm:$0xff] }
  0xbd   : > { %708 = vst [vmem:[%s1463_s28 + $0x328] sm:$0xff] %v580_v49  ;;  %v583_v58 = vadd.f32 %v455_v56, %v327_v55  ;;  %v456_v60 = vld [vmem:[%s1448_s30 + $0x348] sm:$0xff]  ;;  %v329_v61 = vld [vmem:[%s1441_s6 + $0x350] sm:$0xff]  ;;  %v330_v0 = vld [vmem:[%s1441_s6 + $0x358] sm:$0xff] }
  0xbe   : > { %709 = vst [vmem:[%s1463_s28 + $0x330] sm:$0xff] %v581_v53  ;;  %v584_v62 = vadd.f32 %v456_v60, %v328_v59  ;;  %v457_v63 = vld [vmem:[%s1448_s30 + $0x350] sm:$0xff]  ;;  %v458_v1 = vld [vmem:[%s1448_s30 + $0x358] sm:$0xff]  ;;  %710 = vst [vmem:[%s1463_s28 + $0x338] sm:$0xff] %v582_v57 }
  0xbf   : > { %711 = vst [vmem:[%s1463_s28 + $0x340] sm:$0xff] %v583_v58  ;;  %v585_v2 = vadd.f32 %v457_v63, %v329_v61  ;;  %v586_v3 = vadd.f32 %v458_v1, %v330_v0  ;;  %v331_v4 = vld [vmem:[%s1441_s6 + $0x360] sm:$0xff]  ;;  %v332_v6 = vld [vmem:[%s1441_s6 + $0x368] sm:$0xff]  ;;  %v333_v9 = vld [vmem:[%s1441_s6 + $0x370] sm:$0xff] }
  0xc0   : > { %v459_v5 = vld [vmem:[%s1448_s30 + $0x360] sm:$0xff]  ;;  %712 = vst [vmem:[%s1463_s28 + $0x348] sm:$0xff] %v584_v62  ;;  %v460_v8 = vld [vmem:[%s1448_s30 + $0x368] sm:$0xff]  ;;  %v461_v10 = vld [vmem:[%s1448_s30 + $0x370] sm:$0xff] }
  0xc1   : > { %v587_v7 = vadd.f32 %v459_v5, %v331_v4  ;;  %713 = vst [vmem:[%s1463_s28 + $0x350] sm:$0xff] %v585_v2  ;;  %714 = vst [vmem:[%s1463_s28 + $0x358] sm:$0xff] %v586_v3  ;;  %v588_v11 = vadd.f32 %v460_v8, %v332_v6  ;;  %v589_v12 = vadd.f32 %v461_v10, %v333_v9  ;;  %v334_v13 = vld [vmem:[%s1441_s6 + $0x378] sm:$0xff]  ;;  %v335_v15 = vld [vmem:[%s1441_s6 + $0x380] sm:$0xff] }
  0xc2   : > { %v462_v14 = vld [vmem:[%s1448_s30 + $0x378] sm:$0xff]  ;;  %v463_v17 = vld [vmem:[%s1448_s30 + $0x380] sm:$0xff]  ;;  %v336_v18 = vld [vmem:[%s1441_s6 + $0x388] sm:$0xff] }
  0xc3   : > { %715 = vst [vmem:[%s1463_s28 + $0x360] sm:$0xff] %v587_v7  ;;  %v590_v16 = vadd.f32 %v462_v14, %v334_v13  ;;  %v464_v19 = vld [vmem:[%s1448_s30 + $0x388] sm:$0xff]  ;;  %716 = vst [vmem:[%s1463_s28 + $0x368] sm:$0xff] %v588_v11  ;;  %v591_v20 = vadd.f32 %v463_v17, %v335_v15  ;;  %v337_v22 = vld [vmem:[%s1441_s6 + $0x390] sm:$0xff] }
  0xc4   : > { %717 = vst [vmem:[%s1463_s28 + $0x370] sm:$0xff] %v589_v12  ;;  %v592_v21 = vadd.f32 %v464_v19, %v336_v18  ;;  %v465_v23 = vld [vmem:[%s1448_s30 + $0x390] sm:$0xff]  ;;  %v338_v24 = vld [vmem:[%s1441_s6 + $0x398] sm:$0xff]  ;;  %v339_v27 = vld [vmem:[%s1441_s6 + $0x3a0] sm:$0xff] }
  0xc5   : > { %718 = vst [vmem:[%s1463_s28 + $0x378] sm:$0xff] %v590_v16  ;;  %v593_v25 = vadd.f32 %v465_v23, %v337_v22  ;;  %v466_v26 = vld [vmem:[%s1448_s30 + $0x398] sm:$0xff]  ;;  %v467_v28 = vld [vmem:[%s1448_s30 + $0x3a0] sm:$0xff]  ;;  %719 = vst [vmem:[%s1463_s28 + $0x380] sm:$0xff] %v591_v20 }
  0xc6   : > { %720 = vst [vmem:[%s1463_s28 + $0x388] sm:$0xff] %v592_v21  ;;  %v594_v29 = vadd.f32 %v466_v26, %v338_v24  ;;  %v595_v30 = vadd.f32 %v467_v28, %v339_v27  ;;  %v340_v31 = vld [vmem:[%s1441_s6 + $0x3a8] sm:$0xff]  ;;  %v341_v33 = vld [vmem:[%s1441_s6 + $0x3b0] sm:$0xff]  ;;  %v342_v36 = vld [vmem:[%s1441_s6 + $0x3b8] sm:$0xff] }
  0xc7   : > { %v468_v32 = vld [vmem:[%s1448_s30 + $0x3a8] sm:$0xff]  ;;  %721 = vst [vmem:[%s1463_s28 + $0x390] sm:$0xff] %v593_v25  ;;  %v469_v35 = vld [vmem:[%s1448_s30 + $0x3b0] sm:$0xff]  ;;  %v470_v37 = vld [vmem:[%s1448_s30 + $0x3b8] sm:$0xff] }
  0xc8   : > { %v596_v34 = vadd.f32 %v468_v32, %v340_v31  ;;  %722 = vst [vmem:[%s1463_s28 + $0x398] sm:$0xff] %v594_v29  ;;  %723 = vst [vmem:[%s1463_s28 + $0x3a0] sm:$0xff] %v595_v30  ;;  %v597_v38 = vadd.f32 %v469_v35, %v341_v33  ;;  %v598_v39 = vadd.f32 %v470_v37, %v342_v36  ;;  %v343_v40 = vld [vmem:[%s1441_s6 + $0x3c0] sm:$0xff]  ;;  %v344_v42 = vld [vmem:[%s1441_s6 + $0x3c8] sm:$0xff] }
  0xc9   : > { %v471_v41 = vld [vmem:[%s1448_s30 + $0x3c0] sm:$0xff]  ;;  %v472_v44 = vld [vmem:[%s1448_s30 + $0x3c8] sm:$0xff]  ;;  %v345_v45 = vld [vmem:[%s1441_s6 + $0x3d0] sm:$0xff] }
  0xca   : > { %724 = vst [vmem:[%s1463_s28 + $0x3a8] sm:$0xff] %v596_v34  ;;  %v599_v43 = vadd.f32 %v471_v41, %v343_v40  ;;  %v473_v46 = vld [vmem:[%s1448_s30 + $0x3d0] sm:$0xff]  ;;  %725 = vst [vmem:[%s1463_s28 + $0x3b0] sm:$0xff] %v597_v38  ;;  %v600_v47 = vadd.f32 %v472_v44, %v344_v42  ;;  %v346_v49 = vld [vmem:[%s1441_s6 + $0x3d8] sm:$0xff] }
  0xcb   : > { %726 = vst [vmem:[%s1463_s28 + $0x3b8] sm:$0xff] %v598_v39  ;;  %v601_v48 = vadd.f32 %v473_v46, %v345_v45  ;;  %v474_v50 = vld [vmem:[%s1448_s30 + $0x3d8] sm:$0xff]  ;;  %v347_v51 = vld [vmem:[%s1441_s6 + $0x3e0] sm:$0xff]  ;;  %v348_v54 = vld [vmem:[%s1441_s6 + $0x3e8] sm:$0xff] }
  0xcc   : > { %727 = vst [vmem:[%s1463_s28 + $0x3c0] sm:$0xff] %v599_v43  ;;  %v602_v52 = vadd.f32 %v474_v50, %v346_v49  ;;  %v475_v53 = vld [vmem:[%s1448_s30 + $0x3e0] sm:$0xff]  ;;  %v476_v55 = vld [vmem:[%s1448_s30 + $0x3e8] sm:$0xff]  ;;  %728 = vst [vmem:[%s1463_s28 + $0x3c8] sm:$0xff] %v600_v47 }
  0xcd   : > { %729 = vst [vmem:[%s1463_s28 + $0x3d0] sm:$0xff] %v601_v48  ;;  %v603_v56 = vadd.f32 %v475_v53, %v347_v51  ;;  %v604_v57 = vadd.f32 %v476_v55, %v348_v54  ;;  %v349_v58 = vld [vmem:[%s1441_s6 + $0x3f0] sm:$0xff]  ;;  %v350_v60 = vld [vmem:[%s1441_s6 + $0x3f8] sm:$0xff]  ;;  %s1057_s6 = scalar_lea.vmem %s1847_s21, 16384 }
  0xce   : > { %v477_v59 = vld [vmem:[%s1448_s30 + $0x3f0] sm:$0xff]  ;;  %730 = vst [vmem:[%s1463_s28 + $0x3d8] sm:$0xff] %v602_v52  ;;  %v478_v62 = vld [vmem:[%s1448_s30 + $0x3f8] sm:$0xff]  ;;  %p1058_p0 = scmp.ne.s32.totalorder %s1847_s21, %s1057_s6  ;;  %p1065_p5 = scmp.lt.s32.totalorder %s1063_s9, %s1057_s6 }
  0xcf   : > { %v605_v61 = vadd.f32 %v477_v59, %v349_v58  ;;  %731 = vst [vmem:[%s1463_s28 + $0x3e0] sm:$0xff] %v603_v56  ;;  %732 = vst [vmem:[%s1463_s28 + $0x3e8] sm:$0xff] %v604_v57  ;;  %v606_v63 = vadd.f32 %v478_v62, %v350_v60 }
  0xd0   : > { %p1059_p8 = pnand %p1058_p0, %p1951_p3  ;;  %p1066_p1 = por %p1065_p5, %p1064_p12 }
  0xd1   : > { %733 = vst [vmem:[%s1463_s28 + $0x3f0] sm:$0xff] %v605_v61  ;;  %734 = vst [vmem:[%s1463_s28 + $0x3f8] sm:$0xff] %v606_v63 }
  0xd2   : > { %p1060_p7 = pneg %p1059_p8 }
  0xd4   : > { %p1067_p6 = pnand %p1066_p1, %p1060_p7 }
  0xd6   : > { %1070 = shalt.err (!%p1067_p6)
}
  0xd7   : > { %s1071_s30 = scalar_lea.hbm %s1845_s3, 16384  ;;  %s1075_s2 = scalar_lea.hbm %s1950_s7, 65536 }
  0xd8   : > { %p1072_p2 = scmp.ne.s32.totalorder %s1845_s3, %s1071_s30  ;;  %p1076_p4 = scmp.lt.u32.totalorder %s1845_s3, %s1950_s7 }
  0xd9   : > { %p1077_p10 = scmp.lt.u32.totalorder %s1075_s2, %s1071_s30  ;;  %p1079_p0 = scmp.lt.u32.totalorder %s1071_s30, %s1845_s3 }
  0xda   : > { %p1073_p9 = pnand %p1072_p2, %p1951_p3 }
  0xdb   : > { %p1078_p11 = por %p1077_p10, %p1076_p4 }
  0xdc   : > { %p1074_p13 = pneg %p1073_p9 }
  0xdd   : > { %p1080_p8 = por %p1079_p0, %p1078_p11 }
  0xdf   : > { %p1081_p7 = pnand %p1080_p8, %p1074_p13 }
  0xe1   : > { %1084 = shalt.err (!%p1081_p7)
}
  0xe2   : > { %s1190_s27 = smov 128   ;;  %s1191_s23 = smov 8  }
  0xe3   : > { %890 = dma.vmem_to_hbm [thread:$0]  (%p1951_p3), %s1847_s21, 16384, %s1845_s3, %s736_s22, %s1190_s27, %s1190_s27, %s1191_s23  }
  0xe4 PF: > { %s1952_s12 = sld [smem:[#allocation11_spill]]  ;;  %p904_p12 = scmp.ge.s32.totalorder %s1183_s19, 2 }
  0xe5   : > { %p1953_p5 = scmp.ne.s32.totalorder %s1936_s4, 0 }
  0xe7   : > { %p900_p1 = pnand %p904_p12, %p1953_p5 }
  0xea   : > { %s766_s6 = sand.u32 1, %s1952_s12  }
  0xeb   : > { %s767_s25 = scalar_lea.sflag [#allocation4], %s766_s6 }
  0xec   : > { %1138 = dma.done.wait (!%p900_p1), %s767_s25, 16384  }
  0xed   : > { %1140 = vsyncadd (!%p900_p1), %s767_s25, 4294950912  ;;  %s21_s19 = sadd.s32 1, %s1183_s19   ;;  %s1954_s29 = sld [smem:[#allocation12_spill]] }
  0xee   : > { %p18_p6 = scmp.ge.s32.totalorder %s21_s19, 6   ;;  %s1955_s24 = sld [smem:[#allocation13_spill]] }
  0xef   : > { %s1956_s9 = smov %s1147_s10  ;;  %s1957_s10 = smov %s1151_s11 }
  0xf0   : > { %s1958_s11 = smov %s1376_s8  ;;  %s1959_s12 = smov %s1159_s13 }
  0xf1   : > { %s1960_s13 = smov %s1163_s14  ;;  %s1961_s14 = smov %s1311_s5 }
  0xf2   : > { %s1962_s15 = smov %s1175_s17  ;;  %s1963_s16 = smov %s1179_s18 }
  0xf3   : > { %s1964_s17 = smov %s1954_s29  ;;  %20 = sbr.rel (!%p18_p6) target bundleno = 13 (0xd), region = 86 }
  0xf4   : > { %s1965_s18 = smov %s1955_s24 }
  0xfa   :  { %772 = vsyncpa [#allocation3], 1 }
  0xfb   :  { %774 = vsyncpa [#allocation3 + $0x1], 1 }
  0xfc   :  { %775 = vsyncpa [#allocation6], 1 }
  0xfd   :  { %777 = vsyncpa [#allocation6 + $0x1], 1 }
  0xfe   :  { %778 = vsyncpa [#allocation4], 1 }
  0xff   :  { %780 = vsyncpa [#allocation4 + $0x1], 1 }

</bundles_post_ra>
